<compile_context>
chip_gen: v5e
topology: v5e:2x2
jax: 0.10.0
libtpu: 0.0.40
codegen_flags: <defaults>
</compile_context>

<pallas_src>
import functools
import math

import jax
import jax.numpy as jnp
from jax import lax
from jax.experimental import pallas as pl
from jax.experimental.pallas import tpu as pltpu

_LANES = 128
_SUBLANES = 8
# 8192 x 128 x f32 = 4 MiB per input block.
_MAX_BLOCK_ROWS = 8192
# Keep 2 inputs x 2 pipeline buffers x block_bytes <= ~24 MiB (v7x headroom).
_MAX_PIPELINED_BYTES = 24 * 1024 * 1024


def _round_up(x, m):
    return ((x + m - 1) // m) * m


def _device_kind():
    try:
        return jax.devices()[0].device_kind.lower()
    except Exception:
        return ""


def _num_tensorcores():
    # v7x has 2 TensorCores per chip; v5e/v6e have 1.
    return 2 if "v7" in _device_kind() else 1


def _clipped_sq_diff_sum(a, b):
    """Plain-JAX sum((clip(a)-clip(b))**2) for tiny tails / tiny images."""
    af = jnp.clip(a.astype(jnp.float32), 0.0, 1.0)
    bf = jnp.clip(b.astype(jnp.float32), 0.0, 1.0)
    d = af - bf
    return jnp.sum(d * d)


def _sq_diff_sum_kernel(x_ref, t_ref, o_ref, acc_ref, *, block_rows,
                        inner_blocks, valid_rows, acc_rows, clip_native):
    """Accumulate sum((clip(x) - clip(t))**2) into an (acc_rows, 128) partial."""
    i = pl.program_id(0)   # "parallel" split axis (v7x: one half per TensorCore)
    j = pl.program_id(1)   # "arbitrary" reduction axis over row-blocks

    @pl.when(j == 0)
    def _init():
        acc_ref[...] = jnp.zeros_like(acc_ref)

    if clip_native:
        # clamp is exact in the native float dtype (pure select); clamping
        # before the f32 cast halves that chunk of VPU work for bf16 streams.
        x = jnp.clip(x_ref[...], 0.0, 1.0).astype(jnp.float32)
        t = jnp.clip(t_ref[...], 0.0, 1.0).astype(jnp.float32)
    else:
        x = jnp.clip(x_ref[...].astype(jnp.float32), 0.0, 1.0)
        t = jnp.clip(t_ref[...].astype(jnp.float32), 0.0, 1.0)
    d = x - t
    sq = d * d

    blk = i * inner_blocks + j          # logical (unclamped) block index
    row_start = blk * block_rows
    # Interior blocks (the vast majority) take a mask-free fast path; only the
    # grid-edge block and clamped duplicate blocks pay for the iota mask.
    is_interior = row_start + block_rows <= valid_rows

    @pl.when(is_interior)
    def _acc_fast():
        acc_ref[...] += sq.reshape(block_rows // acc_rows, acc_rows,
                                   _LANES).sum(axis=0)

    @pl.when(jnp.logical_not(is_interior))
    def _acc_edge():
        # Mask grid-edge garbage rows; clamped duplicate blocks mask to zero.
        # NOTE: int32 row indices limit images to < 2**31 elements.
        row = row_start + lax.broadcasted_iota(jnp.int32,
                                               (block_rows, _LANES), 0)
        sq_m = jnp.where(row < valid_rows, sq, 0.0)
        acc_ref[...] += sq_m.reshape(block_rows // acc_rows, acc_rows,
                                     _LANES).sum(axis=0)

    @pl.when(j == pl.num_programs(1) - 1)
    def _finalize():
        # Fold the wide accumulator down to one vreg for the output block.
        o_ref[0, :, :] = acc_ref[...].reshape(
            acc_rows // _SUBLANES, _SUBLANES, _LANES).sum(axis=0)


def mse_loss(x, target):
    """Forward pass of `Loss` with MSE (mean reduction) as the concrete `_loss`."""
    assert target.shape == x.shape
    assert x.ndim == 3 and x.shape[2] == 3 and target.shape[2] == 3, (
        "Images need to be on the format [W,H,3]")

    n = math.prod(x.shape)
    rows = n // _LANES
    tail = n - rows * _LANES

    if rows == 0:
        # Image smaller than one lane row: not worth a kernel launch.
        return _clipped_sq_diff_sum(x, target) / jnp.float32(n)

    xf = x.reshape(-1)
    tf = target.reshape(-1)

    if tail:
        # Non-lane-aligned fallback: stream the aligned prefix through the
        # kernel and fold the (<128-element) tail in with a tiny JAX epilogue
        # (no full-array jnp.pad copies of both inputs).
        x2 = xf[:rows * _LANES].reshape(rows, _LANES)
        t2 = tf[:rows * _LANES].reshape(rows, _LANES)
        tail_sum = _clipped_sq_diff_sum(xf[rows * _LANES:], tf[rows * _LANES:])
    else:
        # Copy-free lane-dense view: (W, H, 3) -> (rows, 128).
        x2 = xf.reshape(rows, _LANES)
        t2 = tf.reshape(rows, _LANES)
        tail_sum = None

    itemsize = max(jnp.dtype(x.dtype).itemsize, jnp.dtype(target.dtype).itemsize)
    # Sublane multiple depends on dtype packing (8 for f32, 16 for bf16, 32 for i8).
    sub = max(_SUBLANES, 32 // max(itemsize, 1))
    vmem_rows = _MAX_PIPELINED_BYTES // (2 * 2 * _LANES * itemsize)
    block_rows = min(_MAX_BLOCK_ROWS, vmem_rows, _round_up(rows, sub))
    block_rows = max(sub, (block_rows // sub) * sub)

    total_blocks = pl.cdiv(rows, block_rows)
    # Two-way split only where there are two TensorCores to feed (v7x);
    # single-TC chips (v5e/v6e) keep a single split (no wasted masked step).
    num_splits = 2 if (_num_tensorcores() >= 2 and total_blocks >= 2) else 1
    inner_blocks = pl.cdiv(total_blocks, num_splits)

    # Widest accumulator (<= 64 rows) that divides the block: up to 8
    # independent vreg add-chains hide VALU add latency under DMA.
    acc_rows = _SUBLANES
    for cand in (64, 32, 16):
        if block_rows % cand == 0:
            acc_rows = cand
            break

    floating = (jnp.issubdtype(x.dtype, jnp.floating)
                and jnp.issubdtype(target.dtype, jnp.floating))
    # Native-dtype clamp only where the chip has a low-precision VPU path
    # (v6e/v7x); v5e casts to f32 first.  (For f32 inputs the two are identical.)
    clip_native = floating and (itemsize >= 4 or "v5" not in _device_kind())

    def in_map(i, j):
        # Clamp so the (possibly over-covering) grid never indexes past the
        # array; clamped (duplicate) blocks are zeroed by the in-kernel mask.
        return (jnp.minimum(i * inner_blocks + j, total_blocks - 1), 0)

    kernel = functools.partial(
        _sq_diff_sum_kernel,
        block_rows=block_rows,
        inner_blocks=inner_blocks,
        valid_rows=rows,
        acc_rows=acc_rows,
        clip_native=clip_native,
    )

    partials = pl.pallas_call(
        kernel,
        out_shape=jax.ShapeDtypeStruct((num_splits, _SUBLANES, _LANES),
                                       jnp.float32),
        grid_spec=pltpu.PrefetchScalarGridSpec(
            num_scalar_prefetch=0,
            grid=(num_splits, inner_blocks),
            in_specs=[
                pl.BlockSpec((block_rows, _LANES), in_map),
                pl.BlockSpec((block_rows, _LANES), in_map),
            ],
            out_specs=pl.BlockSpec((1, _SUBLANES, _LANES),
                                   lambda i, j: (i, 0, 0)),
            scratch_shapes=[pltpu.VMEM((acc_rows, _LANES), jnp.float32)],
        ),
        compiler_params=pltpu.CompilerParams(
            dimension_semantics=("parallel", "arbitrary"),
            vmem_limit_bytes=32 * 1024 * 1024,
        ),
    )(x2, t2)

    # Tiny finalize in plain JAX: cross-lane/sublane/split reduction + mean.
    total = jnp.sum(partials)
    if tail:
        total = total + tail_sum
    return total / jnp.float32(n)


if __name__ == "__main__":
    key = jax.random.PRNGKey(0)

    def reference(x, t):
        xr = jnp.clip(x.astype(jnp.float32), 0.0, 1.0)
        tr = jnp.clip(t.astype(jnp.float32), 0.0, 1.0)
        return jnp.mean((xr - tr) ** 2)

    # Small deterministic shapes; range wider than [0,1] so the clamp matters.
    cases = [
        ((16, 16, 3), jnp.float32),    # lane-aligned, single masked edge block
        ((10, 7, 3), jnp.float32),     # non-lane-aligned: prefix kernel + JAX tail
        ((512, 512, 3), jnp.float32),  # large interior block, mask-free fast path
        ((64, 32, 3), jnp.bfloat16),   # bf16 streaming / native-dtype clamp path
    ]
    for shape, dtype in cases:
        key, k1, k2 = jax.random.split(key, 3)
        xs = jax.random.uniform(k1, shape, jnp.float32, minval=-0.5,
                                maxval=1.5).astype(dtype)
        ts = jax.random.uniform(k2, shape, jnp.float32, minval=-0.5,
                                maxval=1.5).astype(dtype)
        loss = jax.block_until_ready(mse_loss(xs, ts))
        ref = reference(xs, ts)
        assert jnp.allclose(loss, ref, rtol=1e-4, atol=1e-6), (shape, dtype, loss, ref)
    print("KERNEL_OK")
</pallas_src>

<mosaic_0001>
module attributes {stable_mosaic.version = 11 : i64} {
  func.func @_sq_diff_sum_kernel(%arg0: i32, %arg1: i32, %arg2: memref<8x128xf32, #tpu.memory_space<vmem>>, %arg3: memref<8x128xf32, #tpu.memory_space<vmem>>, %arg4: memref<1x8x128xf32, #tpu.memory_space<vmem>>, %arg5: memref<8x128xf32, #tpu.memory_space<vmem>>) attributes {dimension_semantics = [#tpu.dimension_semantics<parallel>, #tpu.dimension_semantics<arbitrary>], iteration_bounds = array<i64: 1, 1>, scalar_prefetch = 0 : i64, scratch_operands = 1 : i64, tpu.core_type = #tpu.core_type<tc>, window_params = [{transform_indices = @transform_0, window_bounds = array<i64: 8, 128>}, {transform_indices = @transform_1, window_bounds = array<i64: 8, 128>}, {transform_indices = @transform_2, window_bounds = array<i64: 1, 8, 128>}]} {
    %c0_i32 = arith.constant 0 : i32
    %0 = arith.cmpi eq, %arg1, %c0_i32 : i32
    %1 = arith.extui %0 : i1 to i32
    %c0_i32_0 = arith.constant 0 : i32
    %2 = arith.cmpi ne, %1, %c0_i32_0 : i32
    scf.if %2 {
      %cst_12 = arith.constant 0.000000e+00 : f32
      %28 = vector.broadcast %cst_12 : f32 to vector<8x128xf32>
      %c0_13 = arith.constant 0 : index
      %c0_14 = arith.constant 0 : index
      %29 = vector.load %arg5[%c0_13, %c0_14] : memref<8x128xf32, #tpu.memory_space<vmem>>, vector<8x128xf32>
      tpu.vector_store %arg5[%c0_13, %c0_14], %28 {strides = array<i32>} : memref<8x128xf32, #tpu.memory_space<vmem>>, vector<8x128xf32>,
    } else {
    }
    %c0 = arith.constant 0 : index
    %c0_1 = arith.constant 0 : index
    %3 = vector.load %arg2[%c0, %c0_1] : memref<8x128xf32, #tpu.memory_space<vmem>>, vector<8x128xf32>
    %cst = arith.constant 0.000000e+00 : f32
    %cst_2 = arith.constant 1.000000e+00 : f32
    %4 = vector.broadcast %cst : f32 to vector<8x128xf32>
    %5 = arith.maximumf %4, %3 : vector<8x128xf32>
    %6 = vector.broadcast %cst_2 : f32 to vector<8x128xf32>
    %7 = arith.minimumf %6, %5 : vector<8x128xf32>
    %c0_3 = arith.constant 0 : index
    %c0_4 = arith.constant 0 : index
    %8 = vector.load %arg3[%c0_3, %c0_4] : memref<8x128xf32, #tpu.memory_space<vmem>>, vector<8x128xf32>
    %cst_5 = arith.constant 0.000000e+00 : f32
    %cst_6 = arith.constant 1.000000e+00 : f32
    %9 = vector.broadcast %cst_5 : f32 to vector<8x128xf32>
    %10 = arith.maximumf %9, %8 : vector<8x128xf32>
    %11 = vector.broadcast %cst_6 : f32 to vector<8x128xf32>
    %12 = arith.minimumf %11, %10 : vector<8x128xf32>
    %13 = arith.subf %7, %12 : vector<8x128xf32>
    %14 = arith.mulf %13, %13 : vector<8x128xf32>
    %c1_i32 = arith.constant 1 : i32
    %15 = arith.muli %arg0, %c1_i32 : i32
    %16 = arith.addi %15, %arg1 : i32
    %c8_i32 = arith.constant 8 : i32
    %17 = arith.muli %16, %c8_i32 : i32
    %c8_i32_7 = arith.constant 8 : i32
    %18 = arith.addi %17, %c8_i32_7 : i32
    %c6_i32 = arith.constant 6 : i32
    %19 = arith.cmpi sle, %18, %c6_i32 : i32
    %20 = arith.extui %19 : i1 to i32
    %c0_i32_8 = arith.constant 0 : i32
    %21 = arith.cmpi ne, %20, %c0_i32_8 : i32
    scf.if %21 {
      %c0_12 = arith.constant 0 : index
      %c0_13 = arith.constant 0 : index
      %28 = vector.load %arg5[%c0_12, %c0_13] : memref<8x128xf32, #tpu.memory_space<vmem>>, vector<8x128xf32>
      %29 = vector.shape_cast %14 : vector<8x128xf32> to vector<1x8x128xf32>
      %cst_14 = arith.constant dense<0.000000e+00> : vector<8x128xf32>
      %30 = vector.multi_reduction <add>, %29, %cst_14 [0] : vector<1x8x128xf32> to vector<8x128xf32>
      %31 = arith.addf %28, %30 : vector<8x128xf32>
      %c0_15 = arith.constant 0 : index
      %c0_16 = arith.constant 0 : index
      %32 = vector.load %arg5[%c0_15, %c0_16] : memref<8x128xf32, #tpu.memory_space<vmem>>, vector<8x128xf32>
      tpu.vector_store %arg5[%c0_15, %c0_16], %31 {strides = array<i32>} : memref<8x128xf32, #tpu.memory_space<vmem>>, vector<8x128xf32>,
    } else {
    }
    %true = arith.constant true
    %22 = arith.xori %19, %true : i1
    %23 = arith.extui %22 : i1 to i32
    %c0_i32_9 = arith.constant 0 : i32
    %24 = arith.cmpi ne, %23, %c0_i32_9 : i32
    scf.if %24 {
      %28 = tpu.iota {dimensions = array<i32: 0>} : vector<8x128xi32>
      %29 = vector.broadcast %17 : i32 to vector<8x128xi32>
      %30 = arith.addi %29, %28 : vector<8x128xi32>
      %c6_i32_12 = arith.constant 6 : i32
      %31 = vector.broadcast %c6_i32_12 : i32 to vector<8x128xi32>
      %32 = arith.cmpi slt, %30, %31 : vector<8x128xi32>
      %cst_13 = arith.constant 0.000000e+00 : f32
      %33 = vector.broadcast %cst_13 : f32 to vector<8x128xf32>
      %34 = arith.select %32, %14, %33 : vector<8x128xi1>, vector<8x128xf32>
      %c0_14 = arith.constant 0 : index
      %c0_15 = arith.constant 0 : index
      %35 = vector.load %arg5[%c0_14, %c0_15] : memref<8x128xf32, #tpu.memory_space<vmem>>, vector<8x128xf32>
      %36 = vector.shape_cast %34 : vector<8x128xf32> to vector<1x8x128xf32>
      %cst_16 = arith.constant dense<0.000000e+00> : vector<8x128xf32>
      %37 = vector.multi_reduction <add>, %36, %cst_16 [0] : vector<1x8x128xf32> to vector<8x128xf32>
      %38 = arith.addf %35, %37 : vector<8x128xf32>
      %c0_17 = arith.constant 0 : index
      %c0_18 = arith.constant 0 : index
      %39 = vector.load %arg5[%c0_17, %c0_18] : memref<8x128xf32, #tpu.memory_space<vmem>>, vector<8x128xf32>
      tpu.vector_store %arg5[%c0_17, %c0_18], %38 {strides = array<i32>} : memref<8x128xf32, #tpu.memory_space<vmem>>, vector<8x128xf32>,
    } else {
    }
    %c0_i32_10 = arith.constant 0 : i32
    %25 = arith.cmpi eq, %arg1, %c0_i32_10 : i32
    %26 = arith.extui %25 : i1 to i32
    %c0_i32_11 = arith.constant 0 : i32
    %27 = arith.cmpi ne, %26, %c0_i32_11 : i32
    scf.if %27 {
      %c0_12 = arith.constant 0 : index
      %c0_13 = arith.constant 0 : index
      %28 = vector.load %arg5[%c0_12, %c0_13] : memref<8x128xf32, #tpu.memory_space<vmem>>, vector<8x128xf32>
      %29 = vector.shape_cast %28 : vector<8x128xf32> to vector<1x8x128xf32>
      %cst_14 = arith.constant dense<0.000000e+00> : vector<8x128xf32>
      %30 = vector.multi_reduction <add>, %29, %cst_14 [0] : vector<1x8x128xf32> to vector<8x128xf32>
      %c0_15 = arith.constant 0 : index
      %c0_16 = arith.constant 0 : index
      %c0_17 = arith.constant 0 : index
      %31 = vector.load %arg4[%c0_15, %c0_16, %c0_17] : memref<1x8x128xf32, #tpu.memory_space<vmem>>, vector<1x8x128xf32>
      %32 = vector.shape_cast %31 : vector<1x8x128xf32> to vector<8x128xf32>
      %33 = vector.shape_cast %30 : vector<8x128xf32> to vector<1x8x128xf32>
      tpu.vector_store %arg4[%c0_15, %c0_16, %c0_17], %33 {strides = array<i32>} : memref<1x8x128xf32, #tpu.memory_space<vmem>>, vector<1x8x128xf32>,
    } else {
    }
    return
  }
  func.func @transform_0(%arg0: i32, %arg1: i32) -> (i32, i32) {
    %c1_i32 = arith.constant 1 : i32
    %0 = arith.muli %arg0, %c1_i32 : i32
    %1 = arith.addi %0, %arg1 : i32
    %c0_i32 = arith.constant 0 : i32
    %2 = arith.minsi %1, %c0_i32 : i32
    %c0_i32_0 = arith.constant 0 : i32
    %c0_i32_1 = arith.constant 0 : i32
    return %2, %c0_i32_0 : i32, i32
  }
  func.func @transform_1(%arg0: i32, %arg1: i32) -> (i32, i32) {
    %c1_i32 = arith.constant 1 : i32
    %0 = arith.muli %arg0, %c1_i32 : i32
    %1 = arith.addi %0, %arg1 : i32
    %c0_i32 = arith.constant 0 : i32
    %2 = arith.minsi %1, %c0_i32 : i32
    %c0_i32_0 = arith.constant 0 : i32
    %c0_i32_1 = arith.constant 0 : i32
    return %2, %c0_i32_0 : i32, i32
  }
  func.func @transform_2(%arg0: i32, %arg1: i32) -> (i32, i32, i32) {
    %c0_i32 = arith.constant 0 : i32
    %c0_i32_0 = arith.constant 0 : i32
    %c0_i32_1 = arith.constant 0 : i32
    return %arg0, %c0_i32, %c0_i32_0 : i32, i32, i32
  }
}

</mosaic_0001>

<bundles_post_ra>
// kernel: tpu_custom_call.1
= control target key start
LH: loop header
LB: loop body
LE: loop exit
PB: predicated region body
PF: predicated region fallthrough
CT: control target
= control target key end

     0   :  { %7 = vsyncpa [#allocation4], 0  ;;  %s230_s0 = inlined_call_operand.hbm [shape: f32[6,128], index: 0, kind: input, shape index: {}]   ;;  %s231_s1 = inlined_call_operand.hbm [shape: f32[6,128], index: 1, kind: input, shape index: {}]   ;;  %s232_s2 = inlined_call_operand.hbm [shape: f32[1,8,128], index: 2, kind: output, shape index: {}]  }
   0x1   :  { %8 = vsyncpa [#allocation7], 0 }
   0x2   :  { %9 = vsyncpa [#allocation5], 0  ;;  %s20_s11 = sshll.u32 %s230_s0, 4  ;;  %s203_s12 = smov [#allocation3]   ;;  %s21_s11 = int_to_ptr.hbm [resolvable:$true] %s20_s11 }
   0x3   :  { %s22_s13 = sshll.u32 %s203_s12, 4  ;;  %s36_s16 = sshll.u32 %s231_s1, 4  ;;  %s23_s13 = int_to_ptr.vmem [resolvable:$true] %s22_s13  ;;  %s37_s16 = int_to_ptr.hbm [resolvable:$true] %s36_s16 }
   0x4   :  { %25 = dma.hbm_to_vmem [thread:$0]  %s21_s11, 128, %s23_s13, [#allocation4]  }
   0x5   :  { %s204_s17 = smov [#allocation6]  }
   0x6   :  { %s38_s18 = sshll.u32 %s204_s17, 4  ;;  %s39_s18 = int_to_ptr.vmem [resolvable:$true] %s38_s18 }
   0x7   :  { %41 = dma.hbm_to_vmem [thread:$0]  %s37_s16, 128, %s39_s18, [#allocation7]  }
   0x8   :  { %197 = dma.done.wait [#allocation4], 128  }
   0x9   :  { %198 = vsyncadd [#allocation4], 4294967168 }
   0xa   :  { %199 = dma.done.wait [#allocation7], 128  }
   0xb   :  { %200 = vsyncadd [#allocation7], 4294967168  ;;  %v84_v0 = vlaneseq  ;;  %v61_v1 = vld [vmem:[#allocation3] sm:$0xff]  ;;  %v64_v2 = vld [vmem:[#allocation6] sm:$0xff]  ;;  %s205_s0 = smov [#allocation8]   ;;  %s107_s21 = sshll.u32 %s232_s2, 4  ;;  %s108_s21 = int_to_ptr.hbm [resolvable:$true] %s107_s21 }
   0xc   :  { %v62_v3 = vmax.f32 %v61_v1, 0.0  ;;  %v65_v4 = vmax.f32 %v64_v2, 0.0  ;;  %s105_s1 = sshll.u32 %s205_s0, 4  ;;  %s106_s1 = int_to_ptr.vmem [resolvable:$true] %s105_s1 }
   0xd   :  { %v85_v5 = vshrl.u32 %v84_v0, 7 }
   0xe   :  { %v63_v6 = vmin.f32 %v62_v3, 1.0  ;;  %v66_v7 = vmin.f32 %v65_v4, 1.0 }
   0xf   :  { %vm88_vm0 = vcmp.lt.s32.totalorder %v85_v5, 6 }
  0x10   :  { %v67_v8 = vsub.f32 %v63_v6, %v66_v7 }
  0x12   :  { %v68_v9 = vmul.f32 %v67_v8, %v67_v8 }
  0x14   :  { %v89_v10 = vsel %vm88_vm0, %v68_v9, 0.0 }
  0x15   :  { %99 = vst [vmem:[#allocation8] sm:$0xff] %v89_v10 }
  0x16   :  { %110 = dma.vmem_to_hbm [thread:$0]  %s106_s1, 128, %s108_s21, [#allocation5]  }
  0x17   :  { %201 = dma.done.wait [#allocation5], 128  }
  0x18   :  { %202 = vsyncadd [#allocation5], 4294967168 }
  0x19   :  { %115 = vsyncpa [#allocation4], 1 }
  0x1a   :  { %116 = vsyncpa [#allocation7], 1 }
  0x1b   :  { %117 = vsyncpa [#allocation5], 1 }

</bundles_post_ra>
